<compile_context>
chip_gen: v6e
topology: v6e:2x2x1
jax: 0.10.0
libtpu: 0.0.40
codegen_flags: <defaults>
</compile_context>

<pallas_src>
import jax
import jax.numpy as jnp
from jax.experimental import pallas as pl
from jax.experimental.pallas import tpu as pltpu

IN_FEATURES = 30
HIDDEN = 128
OUT_FEATURES = 1


def _round_up(n, m):
    return ((n + m - 1) // m) * m


def _tensorcores_per_chip():
    # Soft heuristic: v7x exposes 2 TensorCores per chip; v5e/v6e have 1.
    try:
        kind = jax.devices()[0].device_kind.lower()
    except Exception:
        return 1
    return 2 if "v7" in kind else 1


def _mlp_kernel(x_ref, w1_ref, b1_ref, w2_ref, b2_ref, o_ref):
    # Layer 1 on the MXU: (tb, 30) @ (30, 128), f32 accumulate, then bias + ReLU (VPU).
    h = jnp.dot(x_ref[...], w1_ref[...], preferred_element_type=jnp.float32)
    h = jnp.maximum(h + b1_ref[...], 0.0)
    # Layer 2 on the MXU as well: (tb, 128) @ (128, 1).  The MXU has plenty of slack
    # here, and this keeps the cross-lane reduction off the XLU (only 2 on v6e/v7x).
    z = jnp.dot(h, w2_ref[...], preferred_element_type=jnp.float32) + b2_ref[0, 0]
    o_ref[...] = jax.nn.sigmoid(z).astype(o_ref.dtype)


def mlp_forward(x, w1, b1, w2, b2, *, block_b=1024):
    """x: (B, 30). w1: (30, 128), b1: (1/0-d, 128), w2: (128, 1), b2: scalar-ish.

    Streams x (and w1) in the caller-supplied dtype; all accumulation is f32.
    """
    B = x.shape[0]

    # Tile selection: single tile for small B (no padded-row compute, no extra grid
    # steps), block_b-row tiles otherwise; Pallas masks the partial trailing block.
    if B <= block_b:
        tb = _round_up(max(B, 1), 8)
        if _tensorcores_per_chip() >= 2 and B >= 16:
            # v7x: give each TensorCore a tile.
            tb = _round_up(pl.cdiv(B, 2), 8)
    else:
        tb = block_b
    num_tiles = pl.cdiv(B, tb)

    b1 = b1.reshape(1, HIDDEN).astype(jnp.float32)
    w2 = w2.reshape(HIDDEN, OUT_FEATURES).astype(jnp.float32)
    b2_s = jnp.asarray(b2).reshape(1, 1).astype(jnp.float32)

    cost = pl.CostEstimate(
        flops=2 * B * IN_FEATURES * HIDDEN + 2 * B * HIDDEN,
        transcendentals=B,  # one sigmoid per row
        bytes_accessed=(x.size * x.dtype.itemsize
                        + w1.size * w1.dtype.itemsize
                        + b1.size * 4 + w2.size * 4 + 4
                        + B * OUT_FEATURES * 4),
    )

    return pl.pallas_call(
        _mlp_kernel,
        out_shape=jax.ShapeDtypeStruct((B, OUT_FEATURES), jnp.float32),
        grid=(num_tiles,),
        in_specs=[
            # x is streamed / double-buffered over the batch grid axis.
            pl.BlockSpec((tb, IN_FEATURES), lambda i: (i, 0)),
            # Weights / biases: constant index maps -> stay VMEM-resident.
            pl.BlockSpec((IN_FEATURES, HIDDEN), lambda i: (0, 0)),
            pl.BlockSpec((1, HIDDEN), lambda i: (0, 0)),
            pl.BlockSpec((HIDDEN, OUT_FEATURES), lambda i: (0, 0)),
            # b2: scalar through SMEM, no VMEM tile / DMA stream.
            pl.BlockSpec(memory_space=pltpu.MemorySpace.SMEM),
        ],
        out_specs=pl.BlockSpec((tb, OUT_FEATURES), lambda i: (i, 0)),
        compiler_params=pltpu.CompilerParams(
            dimension_semantics=("parallel",),
        ),
        cost_estimate=cost,
    )(x, w1, b1, w2, b2_s)


def init_params(key):
    # Deterministic synthetic parameters (PyTorch nn.Linear shapes, stored transposed).
    k1, k2, k3, k4 = jax.random.split(key, 4)
    w1 = jax.random.normal(k1, (IN_FEATURES, HIDDEN), jnp.float32) * 0.1
    b1 = jax.random.normal(k2, (1, HIDDEN), jnp.float32) * 0.1
    w2 = jax.random.normal(k3, (HIDDEN, OUT_FEATURES), jnp.float32) * 0.1
    b2 = jax.random.normal(k4, (1, OUT_FEATURES), jnp.float32) * 0.1
    return w1, b1, w2, b2


def reference_forward(x, w1, b1, w2, b2):
    h = jnp.maximum(x @ w1 + b1.reshape(1, HIDDEN), 0.0)
    return jax.nn.sigmoid(h @ w2.reshape(HIDDEN, OUT_FEATURES) + b2.reshape(1, 1))


if __name__ == "__main__":
    key = jax.random.PRNGKey(0)
    kx, kp = jax.random.split(key)
    w1, b1, w2, b2 = init_params(kp)

    # Small batch, exact single tile.
    batch = 8
    x = jax.random.normal(kx, (batch, IN_FEATURES), jnp.float32)
    out = jax.block_until_ready(mlp_forward(x, w1, b1, w2, b2))
    ref = reference_forward(x, w1, b1, w2, b2)
    assert out.shape == (batch, OUT_FEATURES)
    assert jnp.allclose(out, ref, atol=1e-5, rtol=1e-5)

    # Realistic breast-cancer batch (569 rows): single tile with masked partial block,
    # no wrapper pad / slice.
    x569 = jax.random.normal(jax.random.PRNGKey(1), (569, IN_FEATURES), jnp.float32)
    out569 = jax.block_until_ready(mlp_forward(x569, w1, b1, w2, b2))
    ref569 = reference_forward(x569, w1, b1, w2, b2)
    assert out569.shape == (569, OUT_FEATURES)
    assert jnp.allclose(out569, ref569, atol=1e-5, rtol=1e-5)

    # Multi-tile path with a partial trailing block (3 tiles of 1024, last one ragged).
    xb = jax.random.normal(jax.random.PRNGKey(2), (2333, IN_FEATURES), jnp.float32)
    out_big = jax.block_until_ready(mlp_forward(xb, w1, b1, w2, b2))
    ref_big = reference_forward(xb, w1, b1, w2, b2)
    assert out_big.shape == (2333, OUT_FEATURES)
    assert jnp.allclose(out_big, ref_big, atol=1e-5, rtol=1e-5)

    # Caller-supplied bf16 activations/weights (no in-wrapper cast): kernel streams
    # bf16 and accumulates in f32.
    out_bf16 = jax.block_until_ready(
        mlp_forward(xb.astype(jnp.bfloat16), w1.astype(jnp.bfloat16), b1, w2, b2))
    assert jnp.allclose(out_bf16, ref_big, atol=2e-2, rtol=2e-2)

    print("KERNEL_OK")
</pallas_src>

<mosaic_0001>
module attributes {stable_mosaic.version = 11 : i64} {
  func.func @_mlp_kernel(%arg0: i32, %arg1: memref<8x30xf32, #tpu.memory_space<vmem>>, %arg2: memref<30x128xf32, #tpu.memory_space<vmem>>, %arg3: memref<1x128xf32, #tpu.memory_space<vmem>>, %arg4: memref<128x1xf32, #tpu.memory_space<vmem>>, %arg5: memref<1x1xf32, #tpu.memory_space<smem>>, %arg6: memref<8x1xf32, #tpu.memory_space<vmem>>) attributes {dimension_semantics = [#tpu.dimension_semantics<parallel>], iteration_bounds = array<i64: 1>, scalar_prefetch = 0 : i64, scratch_operands = 0 : i64, tpu.core_type = #tpu.core_type<tc>, window_params = [{transform_indices = @transform_0, window_bounds = array<i64: 8, 30>}, {pipeline_mode = #tpu.pipeline_mode<synchronous>, transform_indices = @transform_1, window_bounds = array<i64: 30, 128>}, {pipeline_mode = #tpu.pipeline_mode<synchronous>, transform_indices = @transform_2, window_bounds = array<i64: 1, 128>}, {pipeline_mode = #tpu.pipeline_mode<synchronous>, transform_indices = @transform_3, window_bounds = array<i64: 128, 1>}, {transform_indices = @transform_4, window_bounds = array<i64: 1, 1>}, {transform_indices = @transform_5, window_bounds = array<i64: 8, 1>}]} {
    %c0 = arith.constant 0 : index
    %c0_0 = arith.constant 0 : index
    %0 = vector.load %arg1[%c0, %c0_0] : memref<8x30xf32, #tpu.memory_space<vmem>>, vector<8x30xf32>
    %c0_1 = arith.constant 0 : index
    %c0_2 = arith.constant 0 : index
    %1 = vector.load %arg2[%c0_1, %c0_2] : memref<30x128xf32, #tpu.memory_space<vmem>>, vector<30x128xf32>
    %cst = arith.constant dense<0.000000e+00> : vector<8x128xf32>
    %2 = tpu.matmul %0, %1, %cst {dimension_numbers = #tpu.dot_dimension_numbers<[1], [0], [0], [1], [0, 0, 1, 1], [], []>} : vector<8x30xf32>, vector<30x128xf32>, vector<8x128xf32> -> vector<8x128xf32>
    %c0_3 = arith.constant 0 : index
    %c0_4 = arith.constant 0 : index
    %3 = vector.load %arg3[%c0_3, %c0_4] : memref<1x128xf32, #tpu.memory_space<vmem>>, vector<1x128xf32>
    %4 = vector.broadcast %3 : vector<1x128xf32> to vector<8x128xf32>
    %5 = arith.addf %2, %4 : vector<8x128xf32>
    %cst_5 = arith.constant 0.000000e+00 : f32
    %6 = vector.broadcast %cst_5 : f32 to vector<8x128xf32>
    %7 = arith.maximumf %5, %6 : vector<8x128xf32>
    %c0_6 = arith.constant 0 : index
    %c0_7 = arith.constant 0 : index
    %8 = vector.load %arg4[%c0_6, %c0_7] : memref<128x1xf32, #tpu.memory_space<vmem>>, vector<128x1xf32>
    %cst_8 = arith.constant dense<0.000000e+00> : vector<8x1xf32>
    %9 = tpu.matmul %7, %8, %cst_8 {dimension_numbers = #tpu.dot_dimension_numbers<[1], [0], [0], [1], [0, 0, 1, 1], [], []>} : vector<8x128xf32>, vector<128x1xf32>, vector<8x1xf32> -> vector<8x1xf32>
    %c0_9 = arith.constant 0 : index
    %c0_10 = arith.constant 0 : index
    %10 = memref.load %arg5[%c0_9, %c0_10] : memref<1x1xf32, #tpu.memory_space<smem>>
    %11 = vector.broadcast %10 : f32 to vector<8x1xf32>
    %12 = arith.addf %9, %11 : vector<8x1xf32>
    %13 = arith.negf %12 : vector<8x1xf32>
    %14 = math.exp %13 : vector<8x1xf32>
    %cst_11 = arith.constant 1.000000e+00 : f32
    %15 = vector.broadcast %cst_11 : f32 to vector<8x1xf32>
    %16 = arith.addf %15, %14 : vector<8x1xf32>
    %17 = arith.divf %15, %16 : vector<8x1xf32>
    %c0_12 = arith.constant 0 : index
    %c0_13 = arith.constant 0 : index
    %18 = vector.load %arg6[%c0_12, %c0_13] : memref<8x1xf32, #tpu.memory_space<vmem>>, vector<8x1xf32>
    tpu.vector_store %arg6[%c0_12, %c0_13], %17 {strides = array<i32>} : memref<8x1xf32, #tpu.memory_space<vmem>>, vector<8x1xf32>,
    return
  }
  func.func @transform_0(%arg0: i32) -> (i32, i32) {
    %c0_i32 = arith.constant 0 : i32
    %c0_i32_0 = arith.constant 0 : i32
    return %arg0, %c0_i32 : i32, i32
  }
  func.func @transform_1(%arg0: i32) -> (i32, i32) {
    %c0_i32 = arith.constant 0 : i32
    %c0_i32_0 = arith.constant 0 : i32
    %c0_i32_1 = arith.constant 0 : i32
    return %c0_i32, %c0_i32_0 : i32, i32
  }
  func.func @transform_2(%arg0: i32) -> (i32, i32) {
    %c0_i32 = arith.constant 0 : i32
    %c0_i32_0 = arith.constant 0 : i32
    %c0_i32_1 = arith.constant 0 : i32
    return %c0_i32, %c0_i32_0 : i32, i32
  }
  func.func @transform_3(%arg0: i32) -> (i32, i32) {
    %c0_i32 = arith.constant 0 : i32
    %c0_i32_0 = arith.constant 0 : i32
    %c0_i32_1 = arith.constant 0 : i32
    return %c0_i32, %c0_i32_0 : i32, i32
  }
  func.func @transform_4(%arg0: i32) -> (i32, i32) {
    %c0_i32 = arith.constant 0 : i32
    %c0_i32_0 = arith.constant 0 : i32
    %c0_i32_1 = arith.constant 0 : i32
    return %c0_i32, %c0_i32_0 : i32, i32
  }
  func.func @transform_5(%arg0: i32) -> (i32, i32) {
    %c0_i32 = arith.constant 0 : i32
    %c0_i32_0 = arith.constant 0 : i32
    return %arg0, %c0_i32 : i32, i32
  }
}

</mosaic_0001>

<bundles_post_ra>
// kernel: tpu_custom_call.1
= control target key start
LH: loop header
LB: loop body
LE: loop exit
PB: predicated region body
PF: predicated region fallthrough
CT: control target
= control target key end

     0   :  { %vm37_vm0 = vcmask 1045504   ;;  %v290_v0 = vmov 0.0   ;;  %vm291_vm1 = vmmov 0   ;;  %vm33_vm2 = vcmask 244736   ;;  %s418_s1 = inlined_call_operand.vmem [shape: f32[30,128], index: 1, kind: input, shape index: {}]   ;;  %s419_s3 = inlined_call_operand.vmem [shape: f32[128,1], index: 3, kind: input, shape index: {}]   ;;  %s420_s0 = inlined_call_operand.vmem [shape: f32[8,30], index: 0, kind: input, shape index: {}]   ;;  %s421_s2 = inlined_call_operand.vmem [shape: f32[1,128], index: 2, kind: input, shape index: {}]   ;;  %s422_s4 = inlined_call_operand.<no memory space> [shape: f32[1,1], index: 4, kind: input, shape index: {}]   ;;  %s423_s5 = inlined_call_operand.vmem [shape: f32[8,1], index: 5, kind: output, shape index: {}]  }
   0x1   :  { %238 = vmatprep.subr.mxu0 %v290_v0  ;;  %v25_v1 = vld [vmem:[%s418_s1 + $0x18] sm:$0x3f]  ;;  %v24_v2 = vld [vmem:[%s418_s1 + $0x10] sm:$0xff]  ;;  %246 = vmatprep.mubr.msk.f32.mxu0 %vm291_vm1, %v290_v0  ;;  %v23_v4 = vld [vmem:[%s418_s1 + $0x8] sm:$0xff]  ;;  %v129_v27 = vstv %s422_s4  ;;  %vm206_vm3 = vcmask 7168  }
   0x2   :  { %239 = vmatpush3.msk.msra.mxu0 %vm37_vm0, %v25_v1  ;;  %249 = vmatprep.subr.mxu1 %v290_v0  ;;  %v127_v3 = vld [vmem:[%s419_s3 + $0x78] sm:$0xff]  ;;  %v126_v5 = vld [vmem:[%s419_s3 + $0x70] sm:$0xff]  ;;  %v125_v6 = vld [vmem:[%s419_s3 + $0x68] sm:$0xff] }
   0x3   :  { %240 = vmatprep.subr.mxu0 %v290_v0  ;;  %250 = vmatpush3.msra.mxu1 %v127_v3  ;;  %v22_v7 = vld [vmem:[%s418_s1] sm:$0xff]  ;;  %v123_v10 = vld [vmem:[%s419_s3 + $0x58] sm:$0xff]  ;;  %v122_v11 = vld [vmem:[%s419_s3 + $0x50] sm:$0xff] }
   0x4   :  { %241 = vmatpush3.msra.mxu0 %v24_v2  ;;  %251 = vmatprep.subr.mxu1 %v290_v0  ;;  %v21_v8 = vld [vmem:[%s420_s0] sm:$0xff]  ;;  %v121_v12 = vld [vmem:[%s419_s3 + $0x48] sm:$0xff]  ;;  %v119_v14 = vld [vmem:[%s419_s3 + $0x38] sm:$0xff] }
   0x5   :  { %242 = vmatprep.subr.mxu0 %v290_v0  ;;  %252 = vmatpush3.msra.mxu1 %v126_v5  ;;  %v124_v9 = vld [vmem:[%s419_s3 + $0x60] sm:$0xff]  ;;  %v118_v15 = vld [vmem:[%s419_s3 + $0x30] sm:$0xff]  ;;  %v117_v16 = vld [vmem:[%s419_s3 + $0x28] sm:$0xff] }
   0x6   :  { %243 = vmatpush3.msra.mxu0 %v23_v4  ;;  %253 = vmatprep.subr.mxu1 %v290_v0  ;;  %v120_v13 = vld [vmem:[%s419_s3 + $0x40] sm:$0xff]  ;;  %v115_v18 = vld [vmem:[%s419_s3 + $0x18] sm:$0xff]  ;;  %v114_v19 = vld [vmem:[%s419_s3 + $0x10] sm:$0xff] }
   0x7   :  { %244 = vmatprep.subr.mxu0 %v290_v0  ;;  %254 = vmatpush3.msra.mxu1 %v125_v6  ;;  %v116_v17 = vld [vmem:[%s419_s3 + $0x20] sm:$0xff]  ;;  %v113_v20 = vld [vmem:[%s419_s3 + $0x8] sm:$0xff] }
   0x8   :  { %245 = vmatpush3.msra.mxu0 %v22_v7  ;;  %255 = vmatprep.subr.mxu1 %v290_v0  ;;  %v112_v21 = vld [vmem:[%s419_s3] sm:$0xff] }
   0x9   :  { %247 = vmatmul.mubr.msk.f32.vlgmr.msra.gmra.mxu0 %vm33_vm2, %v21_v8  ;;  %256 = vmatpush3.msra.mxu1 %v124_v9  ;;  %v212_v22 = vld [vmem:[%s421_s2] ss:$0 sm:$0xff] }
   0xa   :  { %257 = vmatprep.subr.mxu1 %v290_v0  ;;  %281 = vmatprep.mubr.msk.f32.mxu1 %vm291_vm1, %v290_v0 }
   0xb   :  { %258 = vmatpush3.msra.mxu1 %v123_v10 }
   0xc   :  { %259 = vmatprep.subr.mxu1 %v290_v0 }
   0xd   :  { %260 = vmatpush3.msra.mxu1 %v122_v11 }
   0xe   :  { %261 = vmatprep.subr.mxu1 %v290_v0 }
   0xf   :  { %262 = vmatpush3.msra.mxu1 %v121_v12 }
  0x10   :  { %263 = vmatprep.subr.mxu1 %v290_v0 }
  0x11   :  { %264 = vmatpush3.msra.mxu1 %v120_v13 }
  0x12   :  { %265 = vmatprep.subr.mxu1 %v290_v0 }
  0x13   :  { %266 = vmatpush3.msra.mxu1 %v119_v14 }
  0x14   :  { %267 = vmatprep.subr.mxu1 %v290_v0 }
  0x15   :  { %268 = vmatpush3.msra.mxu1 %v118_v15 }
  0x16   :  { %269 = vmatprep.subr.mxu1 %v290_v0 }
  0x17   :  { %270 = vmatpush3.msra.mxu1 %v117_v16 }
  0x18   :  { %271 = vmatprep.subr.mxu1 %v290_v0 }
  0x19   :  { %272 = vmatpush3.msra.mxu1 %v116_v17 }
  0x1a   :  { %273 = vmatprep.subr.mxu1 %v290_v0 }
  0x1b   :  { %274 = vmatpush3.msra.mxu1 %v115_v18 }
  0x1c   :  { %275 = vmatprep.subr.mxu1 %v290_v0 }
  0x1d   :  { %276 = vmatpush3.msra.mxu1 %v114_v19 }
  0x1e   :  { %277 = vmatprep.subr.mxu1 %v290_v0 }
  0x1f   :  { %278 = vmatpush3.msra.mxu1 %v113_v20 }
  0x20   :  { %279 = vmatprep.subr.mxu1 %v290_v0 }
  0x21   :  { %280 = vmatpush3.msra.mxu1 %v112_v21 }
  0xc9   :  { %v107_v23 = vpop.f32.mrf.mxu0 }
  0xca   :  { %v108_v24 = vadd.f32 %v212_v22, %v107_v23 }
  0xcb   :  { %v248_v25 = vpop.f32.mrf.mxu0 }
  0xcc   :  { %v111_v26 = vmax.f32 %v108_v24, 0.0 }
  0xce   :  { %282 = vmatmul.mubr.f32.vlgmr.msra.gmra.mxu1 %v111_v26 }
 0x18e   :  { %v196_v28 = vpop.f32.mrf.mxu1 }
 0x18f   :  { %v197_v29 = vadd.f32 %v196_v28, %v129_v27 }
 0x190   :  { %v283_v30 = vpop.f32.mrf.mxu1 }
 0x191   :  { %v215_v31 = vmul.f32 -1.442695, %v197_v29 }
 0x193   :  { %286 = vpow2.f32 %v215_v31 }
 0x1a0   :  { %v287_v32 = vpop.eup %286 }
 0x1a1   :  { %v203_v33 = vadd.f32 1.0, %v287_v32 }
 0x1a3   :  { %288 = vrcp.f32 %v203_v33 }
 0x1b0   :  { %v289_v34 = vpop.eup %288 }
 0x1b1   :  { %207 = vst.msk [vmem:[%s423_s5] sm:$0xff] %vm206_vm3, %v289_v34 }

</bundles_post_ra>
